<compile_context>
chip_gen: v6e
topology: v6e:2x2x1
jax: 0.10.0
libtpu: 0.0.40
codegen_flags: <defaults>
</compile_context>

<pallas_src>
import functools

import jax
import jax.numpy as jnp
from jax.experimental import pallas as pl
from jax.experimental.pallas import tpu as pltpu

_LANES = 128


def _sse_kernel(a_ref, b_ref, o_ref, acc_ref, *, total_rows, block_rows, needs_mask):
    """Accumulate one sample's sum of squared differences across row blocks.

    a_ref/b_ref: (block_rows, 128) native-dtype input tiles.
    o_ref:       (1, 128) per-sample lane-wise partial sums (written in epilogue).
    acc_ref:     (block_rows, 128) f32 VMEM accumulator (pure VPU in the hot loop).
    """
    j = pl.program_id(1)

    @pl.when(j == 0)
    def _():
        acc_ref[...] = jnp.zeros_like(acc_ref)

    d = a_ref[...].astype(jnp.float32) - b_ref[...].astype(jnp.float32)
    dd = d * d
    if needs_mask:
        # Final block may extend past the true row count; zero its contribution.
        row = jax.lax.broadcasted_iota(jnp.int32, dd.shape, 0)
        valid = total_rows - j * block_rows
        dd = jnp.where(row < valid, dd, 0.0)
    acc_ref[...] += dd

    @pl.when(j == pl.num_programs(1) - 1)
    def _():
        # Cross-sublane reduce once per sample (epilogue only, not in hot loop).
        o_ref[...] = jnp.sum(acc_ref[...], axis=0, keepdims=True)


def _pick_block_rows(total_rows, itemsize, override=None):
    """Choose row-block size T (multiple of 8) targeting ~2 MiB/input block."""
    if override is not None:
        t = max(8, (int(override) // 8) * 8)
    else:
        target_bytes = 2 * 1024 * 1024
        t = target_bytes // (_LANES * itemsize)
        t = max(8, (t // 8) * 8)
        t = min(t, 8192)  # cap f32 accumulator + 4 pipeline buffers <= ~12 MiB
    if total_rows <= t:
        return total_rows, False  # single full-extent block per sample, no mask
    return t, (total_rows % t != 0)


def _per_sample_sse(a3, b3, block_rows_override=None):
    """a3, b3: (N, R, 128), same native dtype. Returns (N,) float32 SSE."""
    n, r, lanes = a3.shape
    assert lanes == _LANES
    t, needs_mask = _pick_block_rows(r, jnp.dtype(a3.dtype).itemsize,
                                     block_rows_override)
    num_blocks = pl.cdiv(r, t)

    kernel = functools.partial(
        _sse_kernel, total_rows=r, block_rows=t, needs_mask=needs_mask)

    out = pl.pallas_call(
        kernel,
        out_shape=jax.ShapeDtypeStruct((n, 1, _LANES), jnp.float32),
        grid_spec=pltpu.PrefetchScalarGridSpec(
            num_scalar_prefetch=0,
            grid=(n, num_blocks),
            in_specs=[
                pl.BlockSpec((None, t, _LANES), lambda i, j: (i, j, 0)),
                pl.BlockSpec((None, t, _LANES), lambda i, j: (i, j, 0)),
            ],
            out_specs=pl.BlockSpec((None, 1, _LANES), lambda i, j: (i, 0, 0)),
            scratch_shapes=[pltpu.VMEM((t, _LANES), jnp.float32)],
        ),
        compiler_params=pltpu.CompilerParams(
            # batch axis can shard across TensorCores (v7x); row axis is a reduction.
            dimension_semantics=("parallel", "arbitrary"),
        ),
    )(a3, b3)
    return jnp.sum(out, axis=(1, 2))  # (N,)


@functools.partial(jax.jit, static_argnames=("crop_border", "block_rows"))
def calculate_psnr_pallas(img, img2, *, crop_border, block_rows=None):
    """PSNR for NCHW images in [0, 255]. Returns a scalar (mean over batch)."""
    assert img.shape == img2.shape, "Image shapes must match."
    if crop_border != 0:
        img = img[:, :, crop_border:-crop_border, crop_border:-crop_border]
        img2 = img2[:, :, crop_border:-crop_border, crop_border:-crop_border]

    n, c, h, w = img.shape
    m = c * h * w
    # Keep native dtype: the kernel casts to f32 on the VPU (no wrapper upcast pass).
    a = img.reshape(n, m)
    b = img2.reshape(n, m)

    # Tiny pad to the next multiple of 128 lanes; equal zeros in both inputs
    # contribute 0 to the SSE. This fuses with the crop/reshape copy under jit.
    mp = ((m + _LANES - 1) // _LANES) * _LANES
    if mp != m:
        pad = mp - m
        a = jnp.pad(a, ((0, 0), (0, pad)))
        b = jnp.pad(b, ((0, 0), (0, pad)))
    a3 = a.reshape(n, mp // _LANES, _LANES)
    b3 = b.reshape(n, mp // _LANES, _LANES)

    sse = _per_sample_sse(a3, b3, block_rows)      # (N,)
    mse = sse / jnp.float32(m)                     # divide by true element count
    psnr = 10.0 * jnp.log10(jnp.float32(255.0 * 255.0) / (mse + 1e-8))
    return jnp.mean(psnr)


class CalculatePSNR:
    """JAX/Pallas port of helios CalculatePSNR (test_y_channel=False, tensor path)."""

    def __init__(self, crop_border: int, input_order: str = "HWC", test_y_channel: bool = False):
        self._crop_border = crop_border
        self._input_order = input_order
        self._test_y_channel = test_y_channel
        if test_y_channel:
            # TODO(synk): Y-channel (YCbCr) evaluation not implemented.
            raise NotImplementedError("test_y_channel=True is not supported in this port.")

    def __call__(self, img: jax.Array, img2: jax.Array) -> jax.Array:
        return calculate_psnr_pallas(img, img2, crop_border=self._crop_border)


def _reference_psnr(img, img2, crop_border):
    """Pure-JAX reference for sanity checking."""
    if crop_border != 0:
        img = img[:, :, crop_border:-crop_border, crop_border:-crop_border]
        img2 = img2[:, :, crop_border:-crop_border, crop_border:-crop_border]
    img = img.astype(jnp.float32)
    img2 = img2.astype(jnp.float32)
    mse = jnp.mean((img - img2) ** 2, axis=(1, 2, 3))
    return jnp.mean(10.0 * jnp.log10(255.0**2 / (mse + 1e-8)))


if __name__ == "__main__":
    key = jax.random.PRNGKey(0)
    k1, k2, k3, k4 = jax.random.split(key, 4)

    # Case 1: small NCHW batch, crop_border=2, single-block (full-extent) path.
    img = jax.random.uniform(k1, (2, 4, 16, 16), dtype=jnp.float32) * 255.0
    noise = jax.random.normal(k2, (2, 4, 16, 16), dtype=jnp.float32) * 5.0
    img2 = jnp.clip(img + noise, 0.0, 255.0)

    metric = CalculatePSNR(crop_border=2)
    psnr = jax.block_until_ready(metric(img, img2))
    ref = jax.block_until_ready(_reference_psnr(img, img2, 2))
    assert jnp.allclose(psnr, ref, rtol=1e-5, atol=1e-4), (psnr, ref)

    # Case 2: exercise the multi-block + remainder-masking path (small block override).
    img_b = jax.random.uniform(k3, (1, 3, 40, 40), dtype=jnp.float32) * 255.0
    img2_b = jnp.clip(
        img_b + jax.random.normal(k4, (1, 3, 40, 40), dtype=jnp.float32) * 3.0, 0.0, 255.0)
    psnr_b = jax.block_until_ready(
        calculate_psnr_pallas(img_b, img2_b, crop_border=0, block_rows=16))
    ref_b = jax.block_until_ready(_reference_psnr(img_b, img2_b, 0))
    assert jnp.allclose(psnr_b, ref_b, rtol=1e-5, atol=1e-4), (psnr_b, ref_b)

    print("KERNEL_OK")
</pallas_src>

<mosaic_0001>
module attributes {stable_mosaic.version = 11 : i64} {
  func.func @_sse_kernel(%arg0: i32, %arg1: i32, %arg2: memref<1x5x128xf32, #tpu.memory_space<vmem>>, %arg3: memref<1x5x128xf32, #tpu.memory_space<vmem>>, %arg4: memref<1x1x128xf32, #tpu.memory_space<vmem>>, %arg5: memref<5x128xf32, #tpu.memory_space<vmem>>) attributes {dimension_semantics = [#tpu.dimension_semantics<parallel>, #tpu.dimension_semantics<arbitrary>], iteration_bounds = array<i64: 2, 1>, scalar_prefetch = 0 : i64, scratch_operands = 1 : i64, tpu.core_type = #tpu.core_type<tc>, window_params = [{transform_indices = @transform_0, window_bounds = array<i64: 1, 5, 128>}, {transform_indices = @transform_1, window_bounds = array<i64: 1, 5, 128>}, {transform_indices = @transform_2, window_bounds = array<i64: 1, 1, 128>}]} {
    %c0_i32 = arith.constant 0 : i32
    %0 = arith.cmpi eq, %arg1, %c0_i32 : i32
    %1 = arith.extui %0 : i1 to i32
    %c0_i32_0 = arith.constant 0 : i32
    %2 = arith.cmpi ne, %1, %c0_i32_0 : i32
    scf.if %2 {
      %cst = arith.constant 0.000000e+00 : f32
      %15 = vector.broadcast %cst : f32 to vector<5x128xf32>
      %c0_12 = arith.constant 0 : index
      %c0_13 = arith.constant 0 : index
      %16 = vector.load %arg5[%c0_12, %c0_13] : memref<5x128xf32, #tpu.memory_space<vmem>>, vector<5x128xf32>
      tpu.vector_store %arg5[%c0_12, %c0_13], %15 {strides = array<i32>} : memref<5x128xf32, #tpu.memory_space<vmem>>, vector<5x128xf32>,
    } else {
    }
    %c0 = arith.constant 0 : index
    %c0_1 = arith.constant 0 : index
    %c0_2 = arith.constant 0 : index
    %3 = vector.load %arg2[%c0, %c0_1, %c0_2] : memref<1x5x128xf32, #tpu.memory_space<vmem>>, vector<1x5x128xf32>
    %4 = vector.shape_cast %3 : vector<1x5x128xf32> to vector<5x128xf32>
    %c0_3 = arith.constant 0 : index
    %c0_4 = arith.constant 0 : index
    %c0_5 = arith.constant 0 : index
    %5 = vector.load %arg3[%c0_3, %c0_4, %c0_5] : memref<1x5x128xf32, #tpu.memory_space<vmem>>, vector<1x5x128xf32>
    %6 = vector.shape_cast %5 : vector<1x5x128xf32> to vector<5x128xf32>
    %7 = arith.subf %4, %6 : vector<5x128xf32>
    %8 = arith.mulf %7, %7 : vector<5x128xf32>
    %c0_6 = arith.constant 0 : index
    %c0_7 = arith.constant 0 : index
    %9 = vector.load %arg5[%c0_6, %c0_7] : memref<5x128xf32, #tpu.memory_space<vmem>>, vector<5x128xf32>
    %10 = arith.addf %9, %8 : vector<5x128xf32>
    %c0_8 = arith.constant 0 : index
    %c0_9 = arith.constant 0 : index
    %11 = vector.load %arg5[%c0_8, %c0_9] : memref<5x128xf32, #tpu.memory_space<vmem>>, vector<5x128xf32>
    tpu.vector_store %arg5[%c0_8, %c0_9], %10 {strides = array<i32>} : memref<5x128xf32, #tpu.memory_space<vmem>>, vector<5x128xf32>,
    %c0_i32_10 = arith.constant 0 : i32
    %12 = arith.cmpi eq, %arg1, %c0_i32_10 : i32
    %13 = arith.extui %12 : i1 to i32
    %c0_i32_11 = arith.constant 0 : i32
    %14 = arith.cmpi ne, %13, %c0_i32_11 : i32
    scf.if %14 {
      %c0_12 = arith.constant 0 : index
      %c0_13 = arith.constant 0 : index
      %15 = vector.load %arg5[%c0_12, %c0_13] : memref<5x128xf32, #tpu.memory_space<vmem>>, vector<5x128xf32>
      %cst = arith.constant dense<0.000000e+00> : vector<128xf32>
      %16 = vector.multi_reduction <add>, %15, %cst [0] : vector<5x128xf32> to vector<128xf32>
      %17 = vector.shape_cast %16 : vector<128xf32> to vector<1x128xf32>
      %c0_14 = arith.constant 0 : index
      %c0_15 = arith.constant 0 : index
      %c0_16 = arith.constant 0 : index
      %18 = vector.load %arg4[%c0_14, %c0_15, %c0_16] : memref<1x1x128xf32, #tpu.memory_space<vmem>>, vector<1x1x128xf32>
      %19 = vector.shape_cast %18 : vector<1x1x128xf32> to vector<1x128xf32>
      %20 = vector.shape_cast %17 : vector<1x128xf32> to vector<1x1x128xf32>
      tpu.vector_store %arg4[%c0_14, %c0_15, %c0_16], %20 {strides = array<i32>} : memref<1x1x128xf32, #tpu.memory_space<vmem>>, vector<1x1x128xf32>,
    } else {
    }
    return
  }
  func.func @transform_0(%arg0: i32, %arg1: i32) -> (i32, i32, i32) {
    %c0_i32 = arith.constant 0 : i32
    %c0_i32_0 = arith.constant 0 : i32
    return %arg0, %arg1, %c0_i32 : i32, i32, i32
  }
  func.func @transform_1(%arg0: i32, %arg1: i32) -> (i32, i32, i32) {
    %c0_i32 = arith.constant 0 : i32
    %c0_i32_0 = arith.constant 0 : i32
    return %arg0, %arg1, %c0_i32 : i32, i32, i32
  }
  func.func @transform_2(%arg0: i32, %arg1: i32) -> (i32, i32, i32) {
    %c0_i32 = arith.constant 0 : i32
    %c0_i32_0 = arith.constant 0 : i32
    %c0_i32_1 = arith.constant 0 : i32
    return %arg0, %c0_i32, %c0_i32_0 : i32, i32, i32
  }
}

</mosaic_0001>

<bundles_post_ra>
// kernel: calculate_psnr_pallas.1
= control target key start
LH: loop header
LB: loop body
LE: loop exit
PB: predicated region body
PF: predicated region fallthrough
CT: control target
= control target key end

     0   :  { %s360_s9 = smov 0   ;;  %s362_s10 = smov 0   ;;  %s396_s0 = inlined_call_operand.vmem [shape: f32[2,5,128], index: 0, kind: input, shape index: {}]   ;;  %s397_s1 = inlined_call_operand.vmem [shape: f32[2,5,128], index: 1, kind: input, shape index: {}]   ;;  %s398_s2 = inlined_call_operand.vmem [shape: f32[2,1,128], index: 2, kind: output, shape index: {}]  }
   0x1   :  { %s364_s11 = smov 0  }
   0x2 LB: > { %s24_s12 = sadd.s32 1, %s338_s10  ;;  %p290_p0 = scmp.ge.s32.totalorder %s342_s11, 1  ;;  %s342_s11 = sphi %s364_s11, %s12_s11   ;;  %s338_s10 = sphi %s362_s10, %s400_s10   ;;  %s334_s9 = sphi %s360_s9, %s399_s9  }
   0x3   : > { %p26_p1 = scmp.ge.s32.totalorder %s24_s12, 2  ;;  %p142_p2 = scmp.lt.s32.totalorder %s342_s11, 3 }
   0x5   : > { %s402_s12 = smov (%p26_p1, %s24_s12), 0  ;;  %p143_p3 = pnand %p290_p0, %p142_p2 }
   0x6   : > { %p171_p4 = scmp.lt.s32.totalorder (!%p143_p3), %s334_s9, 1 }
   0x7   : > { %146 = sbr.rel (%p143_p3) target bundleno = 45 (0x2d), region = 28 }
   0xc   : > { %v344_v0 = vmov 0.0   ;;  %s404_s9 = smov (!%p171_p4, %s334_s9), 1  ;;  %vm204_vm0 = vcmask 1044480  }
   0xd   : > { %192 = vst [vmem:[#allocation2] sm:$0x1f] %v344_v0  ;;  %s291_s13 = sshll.u32 %s404_s9, 3  ;;  %s187_s22 = scalar_lea.vmem %s398_s2, %s404_s9 }
   0xe   : > { %s177_s16 = scalar_lea.vmem %s396_s0, %s291_s13  ;;  %s184_s19 = scalar_lea.vmem %s397_s1, %s291_s13 }
   0xf   : > { %v193_v1 = vld [vmem:[%s177_s16] sm:$0x1f] }
  0x10   : > { %v194_v2 = vld [vmem:[%s184_s19] sm:$0x1f] }
  0x11   : > { %v195_v3 = vsub.f32 %v193_v1, %v194_v2 }
  0x13   : > { %v196_v5 = vmul.f32 %v195_v3, %v195_v3 }
  0x14   : > { %v197_v4 = vld [vmem:[#allocation2] sm:$0x1f] }
  0x15   : > { %v198_v6 = vadd.f32 %v197_v4, %v196_v5 }
  0x17   : > { %199 = vst [vmem:[#allocation2] sm:$0x1f] %v198_v6 }
  0x1e   : > { %v203_v7 = vld [vmem:[#allocation2] sm:$0x1f] }
  0x1f   : > { %v205_v8 = vsel %vm204_vm0, %v203_v7, 0.0 }
  0x20   : > { %v206_v9 = vrot.slane %v205_v8, 4 }
  0x22   : > { %v207_v10 = vadd.f32 %v206_v9, %v205_v8 }
  0x24   : > { %v208_v11 = vrot.slane %v207_v10, 2 }
  0x26   : > { %v209_v12 = vadd.f32 %v208_v11, %v207_v10 }
  0x28   : > { %v210_v13 = vrot.slane %v209_v12, 1 }
  0x2a   : > { %v211_v14 = vadd.f32 %v210_v13, %v209_v12 }
  0x2c   : > { %212 = vst [vmem:[%s187_s22] sm:$0x1] %v211_v14 }
  0x2d PF: > { %s12_s11 = sadd.s32 1, %s342_s11   ;;  %s399_s9 = smov %s338_s10 }
  0x2e   : > { %p9_p5 = scmp.ge.s32.totalorder %s12_s11, 4   ;;  %s400_s10 = smov %s402_s12 }
  0x30   :  { %11 = sbr.rel (!%p9_p5) target bundleno = 2 (0x2), region = 69 }

</bundles_post_ra>
